<compile_context>
chip_gen: v7x
topology: tpu7x:2x2x1
jax: 0.10.0
libtpu: 0.0.40
codegen_flags: <defaults>
</compile_context>

<pallas_src>
import functools
import math

import jax
import jax.numpy as jnp
from jax.experimental import pallas as pl
from jax.experimental.pallas import tpu as pltpu

_LANES = 128
_SUBLANES = 8
_MIB = 1024 * 1024


def _round_up(x: int, m: int) -> int:
    return ((x + m - 1) // m) * m


def _default_rows_per_tile() -> int:
    """Per-generation row-tile size (rows of 128 lanes) for this HBM-bound kernel."""
    kind = ""
    try:
        kind = jax.devices()[0].device_kind.lower()
    except Exception:
        pass
    if "v5 lite" in kind or "v5e" in kind or "v5lite" in kind:
        return 4096      # ~820 GB/s: per-step overhead already <7% at 2 MiB blocks
    if "v7" in kind:
        return 16384     # ~1.6 TB/s/TC: bigger block amortizes ~0.35us/step overhead
    return 8192          # v6e and default


def _sc_partial_kernel(x_ref, y_ref, out_ref, *,
                       chunk_rows, chunks_full, chunks_last, unroll):
    """One row-tile: accumulate (chunk_rows,128) partial sums of (y-x)^2 and y^2."""

    def reduce_chunks(n_chunks):
        def body(c, carry):
            acc_d, acc_y = carry
            r = pl.multiple_of(c * chunk_rows, chunk_rows)
            x = x_ref[pl.ds(r, chunk_rows), :].astype(jnp.float32)
            y = y_ref[pl.ds(r, chunk_rows), :].astype(jnp.float32)
            d = y - x
            return acc_d + d * d, acc_y + y * y

        zero = jnp.zeros((chunk_rows, _LANES), jnp.float32)
        acc_d, acc_y = jax.lax.fori_loop(
            0, n_chunks, body, (zero, zero),
            unroll=max(1, min(unroll, n_chunks)))
        out_ref[0, 0, :, :] = acc_d
        out_ref[0, 1, :, :] = acc_y

    if chunks_last == chunks_full:
        # All tiles are full: single unmasked fast path.
        reduce_chunks(chunks_full)
    else:
        last = pl.num_programs(0) - 1

        # Full tiles pay zero masking / bounds cost.
        @pl.when(pl.program_id(0) != last)
        def _():
            reduce_chunks(chunks_full)

        # Ragged last tile: statically shorter loop; the garbage rows of the
        # overhanging block are simply never read (no iota/select masking).
        @pl.when(pl.program_id(0) == last)
        def _():
            reduce_chunks(chunks_last)


def spectral_convergence_loss(x_mag, y_mag, *, rows_per_tile=None):
    """x_mag, y_mag: (B, #frames, #freq_bins), same shape & dtype. Returns scalar f32."""
    assert x_mag.shape == y_mag.shape, (x_mag.shape, y_mag.shape)
    assert x_mag.dtype == y_mag.dtype, (x_mag.dtype, y_mag.dtype)

    n = math.prod(x_mag.shape)
    itemsize = jnp.dtype(x_mag.dtype).itemsize
    # One packed vreg worth of rows: 8 sublanes * (4 / itemsize) packing.
    chunk_rows = _SUBLANES * max(1, 4 // itemsize)       # 8 (f32), 16 (bf16), 32 (i8)
    quantum = chunk_rows * _LANES

    xf = x_mag.reshape(-1)
    yf = y_mag.reshape(-1)

    # Main region handled by the kernel; the small (< quantum elements) tail is
    # reduced with plain jnp below — no jnp.pad full copy of the inputs.
    n_main = (n // quantum) * quantum

    num = jnp.float32(0.0)
    den = jnp.float32(0.0)

    if n_main > 0:
        rows = n_main // _LANES                          # multiple of chunk_rows
        if rows_per_tile is None:
            rows_per_tile = _default_rows_per_tile()
        tr = min(_round_up(rows_per_tile, chunk_rows), rows)
        num_tiles = (rows + tr - 1) // tr
        chunks_full = tr // chunk_rows
        rows_last = rows - (num_tiles - 1) * tr          # multiple of chunk_rows, >= chunk_rows
        chunks_last = rows_last // chunk_rows

        x2 = xf[:n_main].reshape(rows, _LANES)
        y2 = yf[:n_main].reshape(rows, _LANES)

        kernel = functools.partial(
            _sc_partial_kernel,
            chunk_rows=chunk_rows,
            chunks_full=chunks_full,
            chunks_last=chunks_last,
            unroll=8,
        )

        block_bytes = tr * _LANES * itemsize
        # 2 inputs x 2 pipeline buffers + headroom; cap at 48 MiB for v7x's 64 MiB VMEM.
        vmem_limit = int(min(48 * _MIB, max(32 * _MIB, 4 * block_bytes + 4 * _MIB)))

        out_bytes = num_tiles * 2 * chunk_rows * _LANES * 4
        cost = pl.CostEstimate(
            flops=5 * n_main,
            transcendentals=0,
            bytes_accessed=2 * n_main * itemsize + out_bytes,
        )

        partials = pl.pallas_call(
            kernel,
            out_shape=jax.ShapeDtypeStruct(
                (num_tiles, 2, chunk_rows, _LANES), jnp.float32),
            grid=(num_tiles,),
            in_specs=[
                pl.BlockSpec((tr, _LANES), lambda i: (i, 0)),
                pl.BlockSpec((tr, _LANES), lambda i: (i, 0)),
            ],
            out_specs=pl.BlockSpec((1, 2, chunk_rows, _LANES),
                                   lambda i: (i, 0, 0, 0)),
            compiler_params=pltpu.CompilerParams(
                # Independent tiles -> megacore sharding on v7x (no-op on 1-TC chips).
                dimension_semantics=("parallel",),
                vmem_limit_bytes=vmem_limit,
            ),
            cost_estimate=cost,
        )(x2, y2)

        num = num + jnp.sum(partials[:, 0])
        den = den + jnp.sum(partials[:, 1])

    if n_main < n:
        # Tiny tail (< one packed vreg of elements): plain jnp, no input copy.
        xt = xf[n_main:].astype(jnp.float32)
        yt = yf[n_main:].astype(jnp.float32)
        dt = yt - xt
        num = num + jnp.sum(dt * dt)
        den = den + jnp.sum(yt * yt)

    # NOTE: den == 0 (all-zero y_mag) yields inf/nan, matching the torch reference.
    return jnp.sqrt(num) / jnp.sqrt(den)


if __name__ == "__main__":
    key = jax.random.PRNGKey(0)

    def ref_loss(x, y):
        x = x.astype(jnp.float32)
        y = y.astype(jnp.float32)
        return jnp.sqrt(jnp.sum((y - x) ** 2)) / jnp.sqrt(jnp.sum(y ** 2))

    # (shape, dtype, rows_per_tile, tol) — covers aligned zero-copy path, tail path,
    # multi-tile grid with ragged last tile (pl.when), bf16 path, and tail-only path.
    cases = [
        ((2, 16, 32), jnp.float32, None, 1e-5),     # numel=1024: aligned, single tile
        ((2, 17, 33), jnp.float32, None, 1e-5),     # numel=1122: main + 98-elem tail
        ((3, 40, 64), jnp.float32, 24, 1e-5),       # 3 tiles, ragged last tile + tail
        ((1, 100, 128), jnp.bfloat16, 64, 1e-3),    # bf16: 2 tiles, ragged last + tail
        ((1, 3, 50), jnp.float32, None, 1e-5),      # numel=150 < quantum: tail-only
    ]

    for shape, dtype, rpt, tol in cases:
        key, kx, ky = jax.random.split(key, 3)
        x_mag = jnp.abs(jax.random.normal(kx, shape, dtype=jnp.float32)).astype(dtype)
        y_mag = jnp.abs(jax.random.normal(ky, shape, dtype=jnp.float32)).astype(dtype)

        loss = spectral_convergence_loss(x_mag, y_mag, rows_per_tile=rpt)
        loss = jax.block_until_ready(loss)

        ref = ref_loss(x_mag, y_mag)
        assert jnp.allclose(loss, ref, rtol=tol, atol=tol), (shape, dtype, loss, ref)

    print("KERNEL_OK")
</pallas_src>

<mosaic_0001>
module attributes {stable_mosaic.version = 11 : i64} {
  func.func @_sc_partial_kernel(%arg0: i32, %arg1: memref<8x128xf32, #tpu.memory_space<vmem>>, %arg2: memref<8x128xf32, #tpu.memory_space<vmem>>, %arg3: memref<1x2x8x128xf32, #tpu.memory_space<vmem>>) attributes {dimension_semantics = [#tpu.dimension_semantics<parallel>], iteration_bounds = array<i64: 1>, scalar_prefetch = 0 : i64, scratch_operands = 0 : i64, tpu.core_type = #tpu.core_type<tc>, window_params = [{transform_indices = @transform_0, window_bounds = array<i64: 8, 128>}, {transform_indices = @transform_1, window_bounds = array<i64: 8, 128>}, {transform_indices = @transform_2, window_bounds = array<i64: 1, 2, 8, 128>}]} {
    %cst = arith.constant 0.000000e+00 : f32
    %0 = vector.broadcast %cst : f32 to vector<8x128xf32>
    %c0_i32 = arith.constant 0 : i32
    %c8_i32 = arith.constant 8 : i32
    %1 = arith.muli %c0_i32, %c8_i32 : i32
    %2 = tpu.assume_multiple %1, 8 : i32
    %3 = arith.index_cast %2 : i32 to index
    %c0 = arith.constant 0 : index
    %4 = vector.load %arg1[%3, %c0] : memref<8x128xf32, #tpu.memory_space<vmem>>, vector<8x128xf32>
    %5 = arith.index_cast %2 : i32 to index
    %c0_0 = arith.constant 0 : index
    %6 = vector.load %arg2[%5, %c0_0] : memref<8x128xf32, #tpu.memory_space<vmem>>, vector<8x128xf32>
    %7 = arith.subf %6, %4 : vector<8x128xf32>
    %8 = arith.mulf %7, %7 : vector<8x128xf32>
    %9 = arith.addf %0, %8 : vector<8x128xf32>
    %10 = arith.mulf %6, %6 : vector<8x128xf32>
    %11 = arith.addf %0, %10 : vector<8x128xf32>
    %c1_i32 = arith.constant 1 : i32
    %c0_1 = arith.constant 0 : index
    %c0_2 = arith.constant 0 : index
    %c0_3 = arith.constant 0 : index
    %c0_4 = arith.constant 0 : index
    %12 = vector.load %arg3[%c0_1, %c0_2, %c0_3, %c0_4] : memref<1x2x8x128xf32, #tpu.memory_space<vmem>>, vector<1x1x8x128xf32>
    %13 = vector.shape_cast %12 : vector<1x1x8x128xf32> to vector<8x128xf32>
    %14 = vector.shape_cast %9 : vector<8x128xf32> to vector<1x1x8x128xf32>
    tpu.vector_store %arg3[%c0_1, %c0_2, %c0_3, %c0_4], %14 {strides = array<i32>} : memref<1x2x8x128xf32, #tpu.memory_space<vmem>>, vector<1x1x8x128xf32>,
    %c0_5 = arith.constant 0 : index
    %c1 = arith.constant 1 : index
    %c0_6 = arith.constant 0 : index
    %c0_7 = arith.constant 0 : index
    %15 = vector.load %arg3[%c0_5, %c1, %c0_6, %c0_7] : memref<1x2x8x128xf32, #tpu.memory_space<vmem>>, vector<1x1x8x128xf32>
    %16 = vector.shape_cast %15 : vector<1x1x8x128xf32> to vector<8x128xf32>
    %17 = vector.shape_cast %11 : vector<8x128xf32> to vector<1x1x8x128xf32>
    tpu.vector_store %arg3[%c0_5, %c1, %c0_6, %c0_7], %17 {strides = array<i32>} : memref<1x2x8x128xf32, #tpu.memory_space<vmem>>, vector<1x1x8x128xf32>,
    return
  }
  func.func @transform_0(%arg0: i32) -> (i32, i32) {
    %c0_i32 = arith.constant 0 : i32
    %c0_i32_0 = arith.constant 0 : i32
    return %arg0, %c0_i32 : i32, i32
  }
  func.func @transform_1(%arg0: i32) -> (i32, i32) {
    %c0_i32 = arith.constant 0 : i32
    %c0_i32_0 = arith.constant 0 : i32
    return %arg0, %c0_i32 : i32, i32
  }
  func.func @transform_2(%arg0: i32) -> (i32, i32, i32, i32) {
    %c0_i32 = arith.constant 0 : i32
    %c0_i32_0 = arith.constant 0 : i32
    %c0_i32_1 = arith.constant 0 : i32
    %c0_i32_2 = arith.constant 0 : i32
    return %arg0, %c0_i32, %c0_i32_0, %c0_i32_1 : i32, i32, i32, i32
  }
}

</mosaic_0001>

<bundles_post_ra>
// kernel: tpu_custom_call.1
= control target key start
LH: loop header
LB: loop body
LE: loop exit
PB: predicated region body
PF: predicated region fallthrough
CT: control target
= control target key end

     0   :  { %7 = vsyncpa [#allocation3], 0  ;;  %s197_s0 = inlined_call_operand.hbm [shape: f32[8,128], index: 0, kind: input, shape index: {}]   ;;  %s198_s1 = inlined_call_operand.hbm [shape: f32[8,128], index: 1, kind: input, shape index: {}]   ;;  %s199_s2 = inlined_call_operand.hbm [shape: f32[1,2,8,128], index: 2, kind: output, shape index: {}]  }
   0x1   :  { %8 = vsyncpa [#allocation6], 0 }
   0x2   :  { %9 = vsyncpa [#allocation4], 0  ;;  %s141_s9 = smov [#allocation2]   ;;  %s142_s11 = smov [#allocation5]  }
   0x3   :  { %s16_s10 = sshll.u32 %s141_s9, 4  ;;  %s26_s12 = sshll.u32 %s142_s11, 4  ;;  %s17_s10 = int_to_ptr.vmem [resolvable:$true] %s16_s10  ;;  %s27_s12 = int_to_ptr.vmem [resolvable:$true] %s26_s12 }
   0x4   :  { %s69_s15 = scalar_lea.hbm %s197_s0, 128 }
   0x5   :  { %p70_p0 = scmp.ne.s32.totalorder %s197_s0, %s69_s15  ;;  %p73_p1 = scmp.lt.u32.totalorder %s69_s15, %s197_s0 }
   0x7   :  { %p75_p2 = pnand %p73_p1, %p70_p0 }
   0x9   :  { %78 = shalt.err (!%p75_p2)
}
   0xa   :  { %s79_s20 = scalar_lea.vmem %s17_s10, 128  ;;  %p84_p4 = scmp.lt.s32.totalorder %s17_s10, %s17_s10 }
   0xb   :  { %p80_p3 = scmp.ne.s32.totalorder %s17_s10, %s79_s20  ;;  %p85_p5 = scmp.lt.s32.totalorder %s79_s20, %s79_s20 }
   0xd   :  { %p86_p6 = por %p85_p5, %p84_p4 }
   0xf   :  { %p87_p7 = pnand %p86_p6, %p80_p3 }
  0x11   :  { %90 = shalt.err (!%p87_p7)
}
  0x12   :  { %19 = dma.hbm_to_vmem [thread:$0]  %s197_s0, 128, %s17_s10, [#allocation3]  }
  0x13   :  { %s91_s25 = scalar_lea.hbm %s198_s1, 128 }
  0x14   :  { %p92_p8 = scmp.ne.s32.totalorder %s198_s1, %s91_s25  ;;  %p95_p9 = scmp.lt.u32.totalorder %s91_s25, %s198_s1 }
  0x16   :  { %p97_p10 = pnand %p95_p9, %p92_p8 }
  0x18   :  { %100 = shalt.err (!%p97_p10)
}
  0x19   :  { %s101_s30 = scalar_lea.vmem %s27_s12, 128  ;;  %p106_p12 = scmp.lt.s32.totalorder %s27_s12, %s27_s12 }
  0x1a   :  { %p102_p11 = scmp.ne.s32.totalorder %s27_s12, %s101_s30  ;;  %p107_p13 = scmp.lt.s32.totalorder %s101_s30, %s101_s30 }
  0x1c   :  { %p108_p0 = por %p107_p13, %p106_p12 }
  0x1e   :  { %p109_p1 = pnand %p108_p0, %p102_p11 }
  0x20   :  { %112 = shalt.err (!%p109_p1)
}
  0x21   :  { %29 = dma.hbm_to_vmem [thread:$0]  %s198_s1, 128, %s27_s12, [#allocation6]  }
  0x22   :  { %135 = dma.done.wait [#allocation3], 128  }
  0x23   :  { %136 = vsyncadd [#allocation3], 4294967168 }
  0x24   :  { %137 = dma.done.wait [#allocation6], 128  }
  0x25   :  { %138 = vsyncadd [#allocation6], 4294967168  ;;  %v36_v0 = vld [vmem:[#allocation2] sm:$0xff]  ;;  %v37_v1 = vld [vmem:[#allocation5] sm:$0xff]  ;;  %s143_s4 = smov [#allocation7]  }
  0x26   :  { %s51_s5 = sshll.u32 %s143_s4, 4  ;;  %v38_v2 = vsub.f32 %v37_v1, %v36_v0  ;;  %v41_v3 = vmul.f32 %v37_v1, %v37_v1  ;;  %s52_s5 = int_to_ptr.vmem [resolvable:$true] %s51_s5 }
  0x27   :  { %s113_s6 = scalar_lea.vmem %s52_s5, 256  ;;  %p118_p3 = scmp.lt.s32.totalorder %s52_s5, %s52_s5 }
  0x28   :  { %v39_v4 = vmul.f32 %v38_v2, %v38_v2  ;;  %45 = vst [vmem:[#allocation7 + $0x8] sm:$0xff] %v41_v3  ;;  %p114_p2 = scmp.ne.s32.totalorder %s52_s5, %s113_s6  ;;  %p119_p4 = scmp.lt.s32.totalorder %s113_s6, %s113_s6 }
  0x2a   :  { %43 = vst [vmem:[#allocation7] sm:$0xff] %v39_v4  ;;  %p120_p5 = por %p119_p4, %p118_p3 }
  0x2c   :  { %p121_p6 = pnand %p120_p5, %p114_p2 }
  0x2e   :  { %124 = shalt.err (!%p121_p6)
}
  0x2f   :  { %s125_s8 = scalar_lea.hbm %s199_s2, 256 }
  0x30   :  { %p126_p7 = scmp.ne.s32.totalorder %s199_s2, %s125_s8  ;;  %p129_p8 = scmp.lt.u32.totalorder %s125_s8, %s199_s2 }
  0x32   :  { %p131_p9 = pnand %p129_p8, %p126_p7 }
  0x34   :  { %134 = shalt.err (!%p131_p9)
}
  0x35   :  { %s144_s13 = smov 128   ;;  %s145_s14 = smov 8  }
  0x36   :  { %57 = dma.vmem_to_hbm [thread:$0]  %s52_s5, 256, %s199_s2, [#allocation4], %s144_s13, %s144_s13, %s145_s14  }
  0x37   :  { %139 = dma.done.wait [#allocation4], 256  }
  0x38   :  { %140 = vsyncadd [#allocation4], 4294967040 }
  0x39   :  { %61 = vsyncpa [#allocation3], 1 }
  0x3a   :  { %62 = vsyncpa [#allocation6], 1 }
  0x3b   :  { %63 = vsyncpa [#allocation4], 1 }

</bundles_post_ra>
